<compile_context>
chip_gen: v6e
topology: v6e:2x2x1
jax: 0.10.0
libtpu: 0.0.40
codegen_flags: <defaults>
</compile_context>

<pallas_src>
import jax
import jax.numpy as jnp
from jax.experimental import pallas as pl
from jax.experimental.pallas import tpu as pltpu


_LANE = 128
_VMEM_LIMIT_BYTES = 32 * 1024 * 1024  # safe on v5e/v6e (128 MiB) and v7x (64 MiB)


def _round_up(x, m):
    return ((x + m - 1) // m) * m


def _pad_size(n):
    """Pad N up to a lane-friendly granule so fixed tiles divide evenly."""
    granule = 512 if n >= 512 else _LANE
    return _round_up(n, granule)


def _pick_tile(n_pad, cap):
    """Largest power-of-two tile <= cap that divides the padded extent."""
    for t in (1024, 512, 256, 128):
        if t <= cap and n_pad % t == 0:
            return t
    return n_pad  # unreachable: n_pad is always a multiple of 128


# ----------------------------------------------------------------------------
# Pass 1: dvec = 1 / sqrt(rowsum(W)), tiled over (row_tiles, col_tiles).
# Elementwise tile accumulation (VPU) per k step; one lane reduce at the end.
# ----------------------------------------------------------------------------
def _rowsum_rsqrt_kernel(w_ref, dvec_ref, acc_ref):
    k = pl.program_id(1)

    @pl.when(k == 0)
    def _():
        acc_ref[...] = jnp.zeros_like(acc_ref)

    # Pure VPU elementwise accumulate; keeps the XLU slot free every step.
    acc_ref[...] += w_ref[...]

    @pl.when(k == pl.num_programs(1) - 1)
    def _():
        # Single cross-lane (XLU) reduce per row tile + exact 1/sqrt.
        rowsum = jnp.sum(acc_ref[...], axis=1, keepdims=True)
        dvec_ref[...] = 1.0 / jnp.sqrt(rowsum)


def _compute_dvec(w_pad):
    n_pad = w_pad.shape[0]
    tm = _pick_tile(n_pad, 512)
    tk = _pick_tile(n_pad, 1024)
    grid = (n_pad // tm, n_pad // tk)
    return pl.pallas_call(
        _rowsum_rsqrt_kernel,
        out_shape=jax.ShapeDtypeStruct((n_pad, 1), jnp.float32),
        grid=grid,
        in_specs=[pl.BlockSpec((tm, tk), lambda i, k: (i, k))],
        out_specs=pl.BlockSpec((tm, 1), lambda i, k: (i, 0)),
        scratch_shapes=[pltpu.VMEM((tm, tk), jnp.float32)],
        compiler_params=pltpu.CompilerParams(
            dimension_semantics=("parallel", "arbitrary"),
            vmem_limit_bytes=_VMEM_LIMIT_BYTES,
        ),
    )(w_pad)


# ----------------------------------------------------------------------------
# Pass 2: P = W * dvec (row scale) * dvec.T (col scale), streaming (tm, tn)
# lane-dense tiles.  Pure VPU elementwise; HBM-bound.
# ----------------------------------------------------------------------------
def _scale_kernel(drow_ref, dcol_ref, w_ref, p_ref):
    p_ref[...] = w_ref[...] * drow_ref[...] * dcol_ref[...]


def _compute_p(w_pad, dvec_pad):
    n_pad = w_pad.shape[0]
    tm = _pick_tile(n_pad, 512)
    tn = _pick_tile(n_pad, 1024)
    grid = (n_pad // tm, n_pad // tn)
    dcol = dvec_pad.reshape(1, n_pad)  # tiny relayout done in plain JAX
    return pl.pallas_call(
        _scale_kernel,
        out_shape=jax.ShapeDtypeStruct((n_pad, n_pad), jnp.float32),
        grid=grid,
        in_specs=[
            pl.BlockSpec((tm, 1), lambda i, j: (i, 0)),   # dvec rows
            pl.BlockSpec((1, tn), lambda i, j: (0, j)),   # dvec cols
            pl.BlockSpec((tm, tn), lambda i, j: (i, j)),  # W tile
        ],
        out_specs=pl.BlockSpec((tm, tn), lambda i, j: (i, j)),  # lane-dense P tile
        compiler_params=pltpu.CompilerParams(
            dimension_semantics=("parallel", "parallel"),
            vmem_limit_bytes=_VMEM_LIMIT_BYTES,
        ),
    )(dvec_pad, dcol, w_pad)


@jax.jit
def compute_norm(W):
    """Returns (dvec, P): dvec = 1/sqrt(rowsum(W)), P = diag(dvec) @ W @ diag(dvec)."""
    n = W.shape[0]
    n_pad = _pad_size(n)
    w = W.astype(jnp.float32)
    if n_pad != n:
        # Zero padding: real rowsums are unchanged; padded rows produce inf/NaN
        # only in regions that are sliced away below (elementwise => no mixing).
        w = jnp.pad(w, ((0, n_pad - n), (0, n_pad - n)))
    dvec_pad = _compute_dvec(w)        # (n_pad, 1)   Pallas pass 1
    p_pad = _compute_p(w, dvec_pad)    # (n_pad, n_pad) Pallas pass 2
    return dvec_pad[:n, 0], p_pad[:n, :n]


class ComputeDJax:
    """JAX mirror of the PyTorch computeD module (forward is a no-op)."""

    def __init__(self, W, logicalLabel):
        # W is kept as an attribute (as in the PyTorch module), so we do NOT
        # alias it onto P via input_output_aliases.
        self.W = W
        dvec, P = compute_norm(W)
        self._dvec = dvec              # (N,) degree-normalization vector
        self.P = P
        L = logicalLabel.shape[1]
        # label = cat(logicalLabel, ones(L, L), dim=0)  -- glue, plain JAX
        self.label = jnp.concatenate(
            [logicalLabel, jnp.ones((L, L), dtype=logicalLabel.dtype)], axis=0
        )

    @property
    def D(self):
        # Built lazily: avoids an eager N^2 HBM allocation + write for an
        # attribute that may never be read.
        return jnp.diag(self._dvec)

    def forward(self, data=None):
        # Matches the PyTorch module: forward does nothing.
        return None


def _reference(W):
    rowsum = jnp.sum(W, axis=1)
    dvec = 1.0 / jnp.sqrt(rowsum)
    D_ref = jnp.diag(dvec)
    # Mathematically identical to D_ref @ W @ D_ref, computed elementwise.
    P_ref = W * dvec[:, None] * dvec[None, :]
    return D_ref, P_ref


if __name__ == "__main__":
    key = jax.random.PRNGKey(0)
    k_w, k_w2, k_lbl = jax.random.split(key, 3)

    N = 128          # graph nodes (adjacency W is N x N)
    N_LABELS = 8     # columns of logicalLabel
    N_SAMPLES = 16   # rows of logicalLabel

    # Deterministic synthetic adjacency with strictly positive row sums.
    w_raw = jax.random.uniform(k_w, (N, N), dtype=jnp.float32)
    W = 0.5 * (w_raw + w_raw.T) + 0.1   # symmetric, positive

    logicalLabel = (
        jax.random.uniform(k_lbl, (N_SAMPLES, N_LABELS)) > 0.5
    ).astype(jnp.float32)

    mod = ComputeDJax(W, logicalLabel)
    P = jax.block_until_ready(mod.P)
    D = jax.block_until_ready(mod.D)
    label = jax.block_until_ready(mod.label)

    D_ref, P_ref = _reference(W)
    assert jnp.allclose(D, D_ref, atol=1e-6, rtol=1e-6)
    assert jnp.allclose(P, P_ref, atol=1e-6, rtol=1e-6)
    assert label.shape == (N_SAMPLES + N_LABELS, N_LABELS)

    # Ragged N (not a multiple of 128) exercises the new padding path.
    N2 = 200
    w2_raw = jax.random.uniform(k_w2, (N2, N2), dtype=jnp.float32)
    W2 = 0.5 * (w2_raw + w2_raw.T) + 0.1
    dvec2, P2 = compute_norm(W2)
    P2 = jax.block_until_ready(P2)
    _, P2_ref = _reference(W2)
    assert P2.shape == (N2, N2)
    assert jnp.allclose(P2, P2_ref, atol=1e-6, rtol=1e-6)

    mod.forward(None)  # no-op, as in the PyTorch module
    print("KERNEL_OK")
</pallas_src>

<mosaic_0001>
module attributes {stable_mosaic.version = 11 : i64} {
  func.func @_scale_kernel(%arg0: i32, %arg1: i32, %arg2: memref<128x1xf32, #tpu.memory_space<vmem>>, %arg3: memref<1x128xf32, #tpu.memory_space<vmem>>, %arg4: memref<128x128xf32, #tpu.memory_space<vmem>>, %arg5: memref<128x128xf32, #tpu.memory_space<vmem>>) attributes {dimension_semantics = [#tpu.dimension_semantics<parallel>, #tpu.dimension_semantics<parallel>], iteration_bounds = array<i64: 1, 1>, scalar_prefetch = 0 : i64, scratch_operands = 0 : i64, tpu.core_type = #tpu.core_type<tc>, window_params = [{transform_indices = @transform_0, window_bounds = array<i64: 128, 1>}, {transform_indices = @transform_1, window_bounds = array<i64: 1, 128>}, {transform_indices = @transform_2, window_bounds = array<i64: 128, 128>}, {transform_indices = @transform_3, window_bounds = array<i64: 128, 128>}]} {
    %c0 = arith.constant 0 : index
    %c0_0 = arith.constant 0 : index
    %0 = vector.load %arg4[%c0, %c0_0] : memref<128x128xf32, #tpu.memory_space<vmem>>, vector<128x128xf32>
    %c0_1 = arith.constant 0 : index
    %c0_2 = arith.constant 0 : index
    %1 = vector.load %arg2[%c0_1, %c0_2] : memref<128x1xf32, #tpu.memory_space<vmem>>, vector<128x1xf32>
    %2 = vector.broadcast %1 : vector<128x1xf32> to vector<128x128xf32>
    %3 = arith.mulf %0, %2 : vector<128x128xf32>
    %c0_3 = arith.constant 0 : index
    %c0_4 = arith.constant 0 : index
    %4 = vector.load %arg3[%c0_3, %c0_4] : memref<1x128xf32, #tpu.memory_space<vmem>>, vector<1x128xf32>
    %5 = vector.broadcast %4 : vector<1x128xf32> to vector<128x128xf32>
    %6 = arith.mulf %3, %5 : vector<128x128xf32>
    %c0_5 = arith.constant 0 : index
    %c0_6 = arith.constant 0 : index
    %7 = vector.load %arg5[%c0_5, %c0_6] : memref<128x128xf32, #tpu.memory_space<vmem>>, vector<128x128xf32>
    tpu.vector_store %arg5[%c0_5, %c0_6], %6 {strides = array<i32>} : memref<128x128xf32, #tpu.memory_space<vmem>>, vector<128x128xf32>,
    return
  }
  func.func @transform_0(%arg0: i32, %arg1: i32) -> (i32, i32) {
    %c0_i32 = arith.constant 0 : i32
    %c0_i32_0 = arith.constant 0 : i32
    return %arg0, %c0_i32 : i32, i32
  }
  func.func @transform_1(%arg0: i32, %arg1: i32) -> (i32, i32) {
    %c0_i32 = arith.constant 0 : i32
    %c0_i32_0 = arith.constant 0 : i32
    return %c0_i32, %arg1 : i32, i32
  }
  func.func @transform_2(%arg0: i32, %arg1: i32) -> (i32, i32) {
    %c0_i32 = arith.constant 0 : i32
    return %arg0, %arg1 : i32, i32
  }
  func.func @transform_3(%arg0: i32, %arg1: i32) -> (i32, i32) {
    %c0_i32 = arith.constant 0 : i32
    return %arg0, %arg1 : i32, i32
  }
}

module attributes {stable_mosaic.version = 11 : i64} {
  func.func @_rowsum_rsqrt_kernel(%arg0: i32, %arg1: i32, %arg2: memref<128x128xf32, #tpu.memory_space<vmem>>, %arg3: memref<128x1xf32, #tpu.memory_space<vmem>>, %arg4: memref<128x128xf32, #tpu.memory_space<vmem>>) attributes {dimension_semantics = [#tpu.dimension_semantics<parallel>, #tpu.dimension_semantics<arbitrary>], iteration_bounds = array<i64: 1, 1>, scalar_prefetch = 0 : i64, scratch_operands = 1 : i64, tpu.core_type = #tpu.core_type<tc>, window_params = [{transform_indices = @transform_0, window_bounds = array<i64: 128, 128>}, {transform_indices = @transform_1, window_bounds = array<i64: 128, 1>}]} {
    %c0_i32 = arith.constant 0 : i32
    %0 = arith.cmpi eq, %arg1, %c0_i32 : i32
    %1 = arith.extui %0 : i1 to i32
    %c0_i32_0 = arith.constant 0 : i32
    %2 = arith.cmpi ne, %1, %c0_i32_0 : i32
    scf.if %2 {
      %cst = arith.constant 0.000000e+00 : f32
      %10 = vector.broadcast %cst : f32 to vector<128x128xf32>
      %c0_8 = arith.constant 0 : index
      %c0_9 = arith.constant 0 : index
      %11 = vector.load %arg4[%c0_8, %c0_9] : memref<128x128xf32, #tpu.memory_space<vmem>>, vector<128x128xf32>
      tpu.vector_store %arg4[%c0_8, %c0_9], %10 {strides = array<i32>} : memref<128x128xf32, #tpu.memory_space<vmem>>, vector<128x128xf32>,
    } else {
    }
    %c0 = arith.constant 0 : index
    %c0_1 = arith.constant 0 : index
    %3 = vector.load %arg4[%c0, %c0_1] : memref<128x128xf32, #tpu.memory_space<vmem>>, vector<128x128xf32>
    %c0_2 = arith.constant 0 : index
    %c0_3 = arith.constant 0 : index
    %4 = vector.load %arg2[%c0_2, %c0_3] : memref<128x128xf32, #tpu.memory_space<vmem>>, vector<128x128xf32>
    %5 = arith.addf %3, %4 : vector<128x128xf32>
    %c0_4 = arith.constant 0 : index
    %c0_5 = arith.constant 0 : index
    %6 = vector.load %arg4[%c0_4, %c0_5] : memref<128x128xf32, #tpu.memory_space<vmem>>, vector<128x128xf32>
    tpu.vector_store %arg4[%c0_4, %c0_5], %5 {strides = array<i32>} : memref<128x128xf32, #tpu.memory_space<vmem>>, vector<128x128xf32>,
    %c0_i32_6 = arith.constant 0 : i32
    %7 = arith.cmpi eq, %arg1, %c0_i32_6 : i32
    %8 = arith.extui %7 : i1 to i32
    %c0_i32_7 = arith.constant 0 : i32
    %9 = arith.cmpi ne, %8, %c0_i32_7 : i32
    scf.if %9 {
      %c0_8 = arith.constant 0 : index
      %c0_9 = arith.constant 0 : index
      %10 = vector.load %arg4[%c0_8, %c0_9] : memref<128x128xf32, #tpu.memory_space<vmem>>, vector<128x128xf32>
      %cst = arith.constant dense<0.000000e+00> : vector<128xf32>
      %11 = vector.multi_reduction <add>, %10, %cst [1] : vector<128x128xf32> to vector<128xf32>
      %12 = vector.shape_cast %11 : vector<128xf32> to vector<128x1xf32>
      %13 = math.sqrt %12 : vector<128x1xf32>
      %cst_10 = arith.constant 1.000000e+00 : f32
      %14 = vector.broadcast %cst_10 : f32 to vector<128x1xf32>
      %15 = arith.divf %14, %13 : vector<128x1xf32>
      %c0_11 = arith.constant 0 : index
      %c0_12 = arith.constant 0 : index
      %16 = vector.load %arg3[%c0_11, %c0_12] : memref<128x1xf32, #tpu.memory_space<vmem>>, vector<128x1xf32>
      tpu.vector_store %arg3[%c0_11, %c0_12], %15 {strides = array<i32>} : memref<128x1xf32, #tpu.memory_space<vmem>>, vector<128x1xf32>,
    } else {
    }
    return
  }
  func.func @transform_0(%arg0: i32, %arg1: i32) -> (i32, i32) {
    %c0_i32 = arith.constant 0 : i32
    return %arg0, %arg1 : i32, i32
  }
  func.func @transform_1(%arg0: i32, %arg1: i32) -> (i32, i32) {
    %c0_i32 = arith.constant 0 : i32
    %c0_i32_0 = arith.constant 0 : i32
    return %arg0, %c0_i32 : i32, i32
  }
}

</mosaic_0001>

<bundles_post_ra>
// kernel: compute_norm.3
= control target key start
LH: loop header
LB: loop body
LE: loop exit
PB: predicated region body
PF: predicated region fallthrough
CT: control target
= control target key end

     0   :  { %v227_v2 = vmov 0   ;;  %s371_s0 = inlined_call_operand.vmem [shape: f32[128,1], index: 0, kind: input, shape index: {}]   ;;  %s372_s1 = inlined_call_operand.vmem [shape: f32[1,128], index: 1, kind: input, shape index: {}]   ;;  %s373_s2 = inlined_call_operand.vmem [shape: f32[128,128], index: 2, kind: input, shape index: {}]   ;;  %s374_s3 = inlined_call_operand.hbm [shape: f32[128,128], index: 3, kind: output, shape index: {}]  }
   0x1   :  { %v33_v0 = vld [vmem:[%s371_s0 + $0x10] sm:$0xff]  ;;  %v31_v1 = vld [vmem:[%s371_s0] sm:$0xff]  ;;  %204 = vset.pattern.permute.xlu1 %v227_v2  ;;  %203 = vset.pattern.permute.xlu0 %v227_v2  ;;  %v34_v3 = vld [vmem:[%s371_s0 + $0x18] sm:$0xff] }
   0x2   :  { %59 = vperm.xlu1 %204, %v33_v0   ;;  %49 = vperm.xlu0 %203, %v31_v1   ;;  %v32_v4 = vld [vmem:[%s371_s0 + $0x8] sm:$0xff]  ;;  %v35_v6 = vld [vmem:[%s371_s0 + $0x20] sm:$0xff] }
   0x3   :  { %v36_v5 = vld [vmem:[%s371_s0 + $0x28] sm:$0xff] }
   0x6   :  { %64 = vperm.xlu1 %204, %v34_v3   ;;  %54 = vperm.xlu0 %203, %v32_v4  }
   0x7   :  { %8 = vsyncpa [#allocation3], 0  ;;  %v38_v7 = vld [vmem:[%s371_s0 + $0x38] sm:$0xff]  ;;  %v37_v8 = vld [vmem:[%s371_s0 + $0x30] sm:$0xff]  ;;  %s228_s22 = smov [#allocation2]  }
   0x8   :  { %v40_v9 = vld [vmem:[%s371_s0 + $0x48] sm:$0xff]  ;;  %v39_v10 = vld [vmem:[%s371_s0 + $0x40] sm:$0xff]  ;;  %v42_v11 = vld [vmem:[%s371_s0 + $0x58] sm:$0xff] }
   0x9   :  { %v41_v12 = vld [vmem:[%s371_s0 + $0x50] sm:$0xff]  ;;  %v44_v13 = vld [vmem:[%s371_s0 + $0x68] sm:$0xff]  ;;  %v43_v14 = vld [vmem:[%s371_s0 + $0x60] sm:$0xff] }
   0xa   :  { %74 = vperm.xlu1 %204, %v36_v5   ;;  %69 = vperm.xlu0 %203, %v35_v6   ;;  %v46_v15 = vld [vmem:[%s371_s0 + $0x78] sm:$0xff]  ;;  %v45_v16 = vld [vmem:[%s371_s0 + $0x70] sm:$0xff]  ;;  %v15_v18 = vld [vmem:[%s373_s2] sm:$0xff]  ;;  %s187_s0 = sshll.u32 %s228_s22, 4  ;;  %s188_s0 = int_to_ptr.vmem [resolvable:$true] %s187_s0 }
   0xb   :  { %v17_v17 = vld [vmem:[%s373_s2 + $0x10] sm:$0xff]  ;;  %v308_v19 = vld [vmem:[%s372_s1] ss:$0 sm:$0xff]  ;;  %v18_v24 = vld [vmem:[%s373_s2 + $0x18] sm:$0xff]  ;;  %p210_p1 = scmp.lt.s32.totalorder %s188_s0, %s188_s0 }
   0xc   :  { %v16_v25 = vld [vmem:[%s373_s2 + $0x8] sm:$0xff]  ;;  %v19_v33 = vld [vmem:[%s373_s2 + $0x20] sm:$0xff]  ;;  %v22_v40 = vld [vmem:[%s373_s2 + $0x38] sm:$0xff] }
   0xd   :  { %v20_v32 = vld [vmem:[%s373_s2 + $0x28] sm:$0xff]  ;;  %v21_v41 = vld [vmem:[%s373_s2 + $0x30] sm:$0xff]  ;;  %v23_v49 = vld [vmem:[%s373_s2 + $0x40] sm:$0xff] }
   0xe   :  { %84 = vperm.xlu1 %204, %v38_v7   ;;  %79 = vperm.xlu0 %203, %v37_v8   ;;  %v24_v48 = vld [vmem:[%s373_s2 + $0x48] sm:$0xff]  ;;  %v26_v56 = vld [vmem:[%s373_s2 + $0x58] sm:$0xff]  ;;  %v25_v57 = vld [vmem:[%s373_s2 + $0x50] sm:$0xff] }
   0xf   :  { %v28_v0 = vld [vmem:[%s373_s2 + $0x68] sm:$0xff]  ;;  %v27_v1 = vld [vmem:[%s373_s2 + $0x60] sm:$0xff]  ;;  %v30_v8 = vld [vmem:[%s373_s2 + $0x78] sm:$0xff] }
  0x12   :  { %94 = vperm.xlu1 %204, %v40_v9   ;;  %89 = vperm.xlu0 %203, %v39_v10   ;;  %v29_v9 = vld [vmem:[%s373_s2 + $0x70] sm:$0xff]  ;;  %s205_s2 = scalar_lea.vmem %s188_s0, 2048 }
  0x13   :  { %p206_p0 = scmp.ne.s32.totalorder %s188_s0, %s205_s2  ;;  %p211_p2 = scmp.lt.s32.totalorder %s205_s2, %s205_s2 }
  0x15   :  { %p212_p3 = por %p211_p2, %p210_p1 }
  0x16   :  { %104 = vperm.xlu1 %204, %v42_v11   ;;  %99 = vperm.xlu0 %203, %v41_v12  }
  0x17   :  { %p213_p4 = pnand %p212_p3, %p206_p0 }
  0x1a   :  { %114 = vperm.xlu1 %204, %v44_v13   ;;  %109 = vperm.xlu0 %203, %v43_v14  }
  0x1e   :  { %124 = vperm.xlu1 %204, %v46_v15   ;;  %119 = vperm.xlu0 %203, %v45_v16  }
  0x7d   :  { %v60_v20 = vpop.permute.xlu1 %59  ;;  %v50_v21 = vpop.permute.xlu0 %49 }
  0x7e   :  { %v129_v22 = vmul.f32 %v60_v20, %v17_v17  ;;  %v127_v23 = vmul.f32 %v50_v21, %v15_v18 }
  0x80   :  { %v152_v26 = vmul.f32 %v308_v19, %v129_v22  ;;  %v150_v27 = vmul.f32 %v308_v19, %v127_v23 }
  0x81   :  { %v65_v28 = vpop.permute.xlu1 %64  ;;  %v55_v29 = vpop.permute.xlu0 %54 }
  0x82   :  { %168 = vst [vmem:[#allocation2 + $0x10] sm:$0xff] %v152_v26  ;;  %166 = vst [vmem:[#allocation2] sm:$0xff] %v150_v27  ;;  %v130_v30 = vmul.f32 %v65_v28, %v18_v24  ;;  %v128_v31 = vmul.f32 %v55_v29, %v16_v25 }
  0x84   :  { %v153_v34 = vmul.f32 %v308_v19, %v130_v30  ;;  %v151_v35 = vmul.f32 %v308_v19, %v128_v31 }
  0x85   :  { %v75_v36 = vpop.permute.xlu1 %74  ;;  %v70_v37 = vpop.permute.xlu0 %69 }
  0x86   :  { %169 = vst [vmem:[#allocation2 + $0x18] sm:$0xff] %v153_v34  ;;  %167 = vst [vmem:[#allocation2 + $0x8] sm:$0xff] %v151_v35  ;;  %v132_v38 = vmul.f32 %v75_v36, %v20_v32  ;;  %v131_v39 = vmul.f32 %v70_v37, %v19_v33 }
  0x88   :  { %v155_v42 = vmul.f32 %v308_v19, %v132_v38  ;;  %v154_v43 = vmul.f32 %v308_v19, %v131_v39 }
  0x89   :  { %v85_v44 = vpop.permute.xlu1 %84  ;;  %v80_v45 = vpop.permute.xlu0 %79 }
  0x8a   :  { %171 = vst [vmem:[#allocation2 + $0x28] sm:$0xff] %v155_v42  ;;  %170 = vst [vmem:[#allocation2 + $0x20] sm:$0xff] %v154_v43  ;;  %v134_v46 = vmul.f32 %v85_v44, %v22_v40  ;;  %v133_v47 = vmul.f32 %v80_v45, %v21_v41 }
  0x8c   :  { %v157_v50 = vmul.f32 %v308_v19, %v134_v46  ;;  %v156_v51 = vmul.f32 %v308_v19, %v133_v47 }
  0x8d   :  { %v95_v52 = vpop.permute.xlu1 %94  ;;  %v90_v53 = vpop.permute.xlu0 %89 }
  0x8e   :  { %173 = vst [vmem:[#allocation2 + $0x38] sm:$0xff] %v157_v50  ;;  %172 = vst [vmem:[#allocation2 + $0x30] sm:$0xff] %v156_v51  ;;  %v136_v54 = vmul.f32 %v95_v52, %v24_v48  ;;  %v135_v55 = vmul.f32 %v90_v53, %v23_v49 }
  0x90   :  { %v159_v58 = vmul.f32 %v308_v19, %v136_v54  ;;  %v158_v59 = vmul.f32 %v308_v19, %v135_v55 }
  0x91   :  { %v105_v60 = vpop.permute.xlu1 %104  ;;  %v100_v61 = vpop.permute.xlu0 %99 }
  0x92   :  { %175 = vst [vmem:[#allocation2 + $0x48] sm:$0xff] %v159_v58  ;;  %174 = vst [vmem:[#allocation2 + $0x40] sm:$0xff] %v158_v59  ;;  %v138_v62 = vmul.f32 %v105_v60, %v26_v56  ;;  %v137_v63 = vmul.f32 %v100_v61, %v25_v57 }
  0x94   :  { %v161_v2 = vmul.f32 %v308_v19, %v138_v62  ;;  %v160_v3 = vmul.f32 %v308_v19, %v137_v63 }
  0x95   :  { %v115_v4 = vpop.permute.xlu1 %114  ;;  %v110_v5 = vpop.permute.xlu0 %109 }
  0x96   :  { %177 = vst [vmem:[#allocation2 + $0x58] sm:$0xff] %v161_v2  ;;  %176 = vst [vmem:[#allocation2 + $0x50] sm:$0xff] %v160_v3  ;;  %v140_v6 = vmul.f32 %v115_v4, %v28_v0  ;;  %v139_v7 = vmul.f32 %v110_v5, %v27_v1 }
  0x98   :  { %v163_v10 = vmul.f32 %v308_v19, %v140_v6  ;;  %v162_v11 = vmul.f32 %v308_v19, %v139_v7 }
  0x99   :  { %v125_v12 = vpop.permute.xlu1 %124  ;;  %v120_v13 = vpop.permute.xlu0 %119 }
  0x9a   :  { %179 = vst [vmem:[#allocation2 + $0x68] sm:$0xff] %v163_v10  ;;  %178 = vst [vmem:[#allocation2 + $0x60] sm:$0xff] %v162_v11  ;;  %v142_v14 = vmul.f32 %v125_v12, %v30_v8  ;;  %v141_v15 = vmul.f32 %v120_v13, %v29_v9 }
  0x9c   :  { %v165_v16 = vmul.f32 %v308_v19, %v142_v14  ;;  %v164_v17 = vmul.f32 %v308_v19, %v141_v15 }
  0x9e   :  { %181 = vst [vmem:[#allocation2 + $0x78] sm:$0xff] %v165_v16  ;;  %180 = vst [vmem:[#allocation2 + $0x70] sm:$0xff] %v164_v17 }
  0x9f   :  { %216 = shalt.err (!%p213_p4)
}
  0xa0   :  { %s229_s23 = smov 128   ;;  %s230_s24 = smov 8  }
  0xa1   :  { %193 = dma.vmem_to_hbm [thread:$0]  %s188_s0, 2048, %s374_s3, [#allocation3], %s229_s23, %s229_s23, %s230_s24  }
  0xa2   :  { %225 = dma.done.wait [#allocation3], 2048  }
  0xa3   :  { %226 = vsyncadd [#allocation3], 4294965248 }
  0xa4   :  { %197 = vsyncpa [#allocation3], 1 }

// kernel: compute_norm.2
= control target key start
LH: loop header
LB: loop body
LE: loop exit
PB: predicated region body
PF: predicated region fallthrough
CT: control target
= control target key end

     0   :  { %6 = vsyncpa [#allocation4], 0  ;;  %s412_s6 = smov [#allocation3]   ;;  %s588_s0 = inlined_call_operand.hbm [shape: f32[128,128], index: 0, kind: input, shape index: {}]   ;;  %s589_s1 = inlined_call_operand.vmem [shape: f32[128,1], index: 1, kind: output, shape index: {}]  }
   0x1   :  { %s12_s7 = sshll.u32 %s412_s6, 4  ;;  %s13_s7 = int_to_ptr.vmem [resolvable:$true] %s12_s7 }
   0x2   :  { %s398_s8 = scalar_lea.vmem %s13_s7, 2048  ;;  %p403_p1 = scmp.lt.s32.totalorder %s13_s7, %s13_s7 }
   0x3   :  { %p399_p0 = scmp.ne.s32.totalorder %s13_s7, %s398_s8  ;;  %p404_p2 = scmp.lt.s32.totalorder %s398_s8, %s398_s8 }
   0x5   :  { %p405_p3 = por %p404_p2, %p403_p1 }
   0x7   :  { %p406_p4 = pnand %p405_p3, %p399_p0 }
   0x9   :  { %409 = shalt.err (!%p406_p4)
}
   0xa   :  { %s413_s9 = smov 128   ;;  %s414_s10 = smov 8  }
   0xb   :  { %18 = dma.hbm_to_vmem [thread:$0]  %s588_s0, 2048, %s13_s7, [#allocation4], %s413_s9, %s413_s9, %s414_s10  }
   0xc   :  { %410 = dma.done.wait [#allocation4], 2048  }
   0xd   :  { %411 = vsyncadd [#allocation4], 4294965248  ;;  %v60_v0 = vld [vmem:[#allocation3 + $0x10] sm:$0xff]  ;;  %v58_v1 = vld [vmem:[#allocation3] sm:$0xff]  ;;  %vm301_vm7 = vcmask 7168  }
   0xe   :  { %129 = vadd.xlane.f32.xlu1 %v60_v0  ;;  %125 = vadd.xlane.f32.xlu0 %v58_v1  ;;  %v61_v2 = vld [vmem:[#allocation3 + $0x18] sm:$0xff]  ;;  %v59_v3 = vld [vmem:[#allocation3 + $0x8] sm:$0xff]  ;;  %v62_v5 = vld [vmem:[#allocation3 + $0x20] sm:$0xff] }
   0xf   :  { %v63_v4 = vld [vmem:[#allocation3 + $0x28] sm:$0xff]  ;;  %v65_v6 = vld [vmem:[#allocation3 + $0x38] sm:$0xff]  ;;  %v64_v7 = vld [vmem:[#allocation3 + $0x30] sm:$0xff] }
  0x10   :  { %v67_v8 = vld [vmem:[#allocation3 + $0x48] sm:$0xff]  ;;  %v66_v9 = vld [vmem:[#allocation3 + $0x40] sm:$0xff]  ;;  %v69_v10 = vld [vmem:[#allocation3 + $0x58] sm:$0xff] }
  0x11   :  { %v68_v11 = vld [vmem:[#allocation3 + $0x50] sm:$0xff]  ;;  %v71_v12 = vld [vmem:[#allocation3 + $0x68] sm:$0xff]  ;;  %v70_v13 = vld [vmem:[#allocation3 + $0x60] sm:$0xff] }
  0x12   :  { %131 = vadd.xlane.f32.xlu1 %v61_v2  ;;  %127 = vadd.xlane.f32.xlu0 %v59_v3  ;;  %v73_v14 = vld [vmem:[#allocation3 + $0x78] sm:$0xff]  ;;  %v72_v15 = vld [vmem:[#allocation3 + $0x70] sm:$0xff] }
  0x16   :  { %135 = vadd.xlane.f32.xlu1 %v63_v4  ;;  %133 = vadd.xlane.f32.xlu0 %v62_v5 }
  0x1a   :  { %139 = vadd.xlane.f32.xlu1 %v65_v6  ;;  %137 = vadd.xlane.f32.xlu0 %v64_v7 }
  0x1e   :  { %143 = vadd.xlane.f32.xlu1 %v67_v8  ;;  %141 = vadd.xlane.f32.xlu0 %v66_v9 }
  0x22   :  { %147 = vadd.xlane.f32.xlu1 %v69_v10  ;;  %145 = vadd.xlane.f32.xlu0 %v68_v11 }
  0x26   :  { %151 = vadd.xlane.f32.xlu1 %v71_v12  ;;  %149 = vadd.xlane.f32.xlu0 %v70_v13 }
  0x2a   :  { %155 = vadd.xlane.f32.xlu1 %v73_v14  ;;  %153 = vadd.xlane.f32.xlu0 %v72_v15 }
  0x97   :  { %v130_v16 = vpop.xlane.xlu1 %129  ;;  %v126_v17 = vpop.xlane.xlu0 %125 }
  0x98   :  { %326 = vrsqrt.f32 %v130_v16  ;;  %vm173_vm0 = vcmp.eq.f32.partialorder %v130_v16, inf  ;;  %vm175_vm1 = vcmp.eq.f32.partialorder %v130_v16, 0.0  ;;  %v176_v27 = vand.u32 2147483648, %v130_v16 }
  0x99   :  { %328 = vrsqrt.f32 %v126_v17  ;;  %vm159_vm2 = vcmp.eq.f32.partialorder %v126_v17, inf  ;;  %v162_v32 = vand.u32 2147483648, %v126_v17  ;;  %vm161_vm3 = vcmp.eq.f32.partialorder %v126_v17, 0.0 }
  0x9b   :  { %v132_v18 = vpop.xlane.xlu1 %131  ;;  %v128_v19 = vpop.xlane.xlu0 %127 }
  0x9c   :  { %330 = vrsqrt.f32 %v132_v18  ;;  %vm180_vm4 = vcmp.eq.f32.partialorder %v132_v18, inf  ;;  %vm182_vm5 = vcmp.eq.f32.partialorder %v132_v18, 0.0  ;;  %v183_v39 = vand.u32 2147483648, %v132_v18 }
  0x9d   :  { %332 = vrsqrt.f32 %v128_v19  ;;  %vm166_vm6 = vcmp.eq.f32.partialorder %v128_v19, inf  ;;  %v169_v44 = vand.u32 2147483648, %v128_v19  ;;  %vm168_vm8 = vcmp.eq.f32.partialorder %v128_v19, 0.0 }
  0x9f   :  { %v428_v20 = vpop.xlane.xlu1 %135  ;;  %v430_v21 = vpop.xlane.xlu0 %133 }
  0xa0   :  { %334 = vrsqrt.f32 %v428_v20  ;;  %vm194_vm9 = vcmp.eq.f32.partialorder %v428_v20, inf  ;;  %vm196_vm10 = vcmp.eq.f32.partialorder %v428_v20, 0.0  ;;  %v197_v51 = vand.u32 2147483648, %v428_v20 }
  0xa1   :  { %336 = vrsqrt.f32 %v430_v21  ;;  %vm187_vm11 = vcmp.eq.f32.partialorder %v430_v21, inf  ;;  %v190_v56 = vand.u32 2147483648, %v430_v21  ;;  %vm189_vm12 = vcmp.eq.f32.partialorder %v430_v21, 0.0 }
  0xa3   :  { %v434_v22 = vpop.xlane.xlu1 %139  ;;  %v436_v23 = vpop.xlane.xlu0 %137 }
  0xa4   :  { %338 = vrsqrt.f32 %v434_v22  ;;  %vm208_vm13 = vcmp.eq.f32.partialorder %v434_v22, inf  ;;  %vm210_vm14 = vcmp.eq.f32.partialorder %v434_v22, 0.0  ;;  %v211_v63 = vand.u32 2147483648, %v434_v22 }
  0xa5   :  { %v327_v24 = vpop.eup %326  ;;  %340 = vrsqrt.f32 %v436_v23  ;;  %vm201_vm15 = vcmp.eq.f32.partialorder %v436_v23, inf  ;;  %v204_v4 = vand.u32 2147483648, %v436_v23 }
  0xa6   :  { %v329_v25 = vpop.eup %328  ;;  %v172_v26 = vmul.f32 %v327_v24, %v130_v16 }
  0xa7   :  { %v158_v28 = vmul.f32 %v329_v25, %v126_v17  ;;  %v440_v29 = vpop.xlane.xlu1 %143  ;;  %v442_v30 = vpop.xlane.xlu0 %141 }
  0xa8   :  { %v174_v31 = vsel %vm173_vm0, %v130_v16, %v172_v26  ;;  %342 = vrsqrt.f32 %v440_v29  ;;  %vm203_vm0 = vcmp.eq.f32.partialorder %v436_v23, 0.0  ;;  %v225_v12 = vand.u32 2147483648, %v440_v29 }
  0xa9   :  { %v331_v33 = vpop.eup %330  ;;  %v177_v34 = vsel %vm175_vm1, %v176_v27, %v174_v31  ;;  %v160_v35 = vsel %vm159_vm2, %v126_v17, %v158_v28  ;;  %344 = vrsqrt.f32 %v442_v30  ;;  %vm222_vm1 = vcmp.eq.f32.partialorder %v440_v29, inf }
  0xaa   :  { %v333_v36 = vpop.eup %332  ;;  %346 = vrcp.f32 %v177_v34  ;;  %v163_v37 = vsel %vm161_vm3, %v162_v32, %v160_v35  ;;  %v179_v38 = vmul.f32 %v331_v33, %v132_v18  ;;  %vm224_vm2 = vcmp.eq.f32.partialorder %v440_v29, 0.0 }
  0xab   :  { %348 = vrcp.f32 %v163_v37  ;;  %v165_v40 = vmul.f32 %v333_v36, %v128_v19  ;;  %v446_v41 = vpop.xlane.xlu1 %147  ;;  %v448_v42 = vpop.xlane.xlu0 %145  ;;  %vm215_vm3 = vcmp.eq.f32.partialorder %v442_v30, inf  ;;  %v218_v16 = vand.u32 2147483648, %v442_v30 }
  0xac   :  { %v181_v43 = vsel %vm180_vm4, %v132_v18, %v179_v38  ;;  %350 = vrsqrt.f32 %v446_v41  ;;  %vm217_vm4 = vcmp.eq.f32.partialorder %v442_v30, 0.0  ;;  %v239_v24 = vand.u32 2147483648, %v446_v41 }
  0xad   :  { %v335_v45 = vpop.eup %334  ;;  %v184_v46 = vsel %vm182_vm5, %v183_v39, %v181_v43  ;;  %v167_v47 = vsel %vm166_vm6, %v128_v19, %v165_v40  ;;  %352 = vrsqrt.f32 %v448_v42  ;;  %vm236_vm5 = vcmp.eq.f32.partialorder %v446_v41, inf }
  0xae   :  { %v337_v48 = vpop.eup %336  ;;  %354 = vrcp.f32 %v184_v46  ;;  %v170_v49 = vsel %vm168_vm8, %v169_v44, %v167_v47  ;;  %v193_v50 = vmul.f32 %v335_v45, %v428_v20  ;;  %vm238_vm6 = vcmp.eq.f32.partialorder %v446_v41, 0.0 }
  0xaf   :  { %356 = vrcp.f32 %v170_v49  ;;  %v186_v52 = vmul.f32 %v337_v48, %v430_v21  ;;  %v457_v53 = vpop.xlane.xlu1 %151  ;;  %v459_v54 = vpop.xlane.xlu0 %149  ;;  %vm229_vm8 = vcmp.eq.f32.partialorder %v448_v42, inf  ;;  %v232_v28 = vand.u32 2147483648, %v448_v42 }
  0xb0   :  { %v195_v55 = vsel %vm194_vm9, %v428_v20, %v193_v50  ;;  %358 = vrsqrt.f32 %v457_v53  ;;  %vm231_vm9 = vcmp.eq.f32.partialorder %v448_v42, 0.0  ;;  %v253_v36 = vand.u32 2147483648, %v457_v53 }
  0xb1   :  { %v339_v57 = vpop.eup %338  ;;  %v198_v58 = vsel %vm196_vm10, %v197_v51, %v195_v55  ;;  %v188_v59 = vsel %vm187_vm11, %v430_v21, %v186_v52  ;;  %360 = vrsqrt.f32 %v459_v54  ;;  %vm250_vm10 = vcmp.eq.f32.partialorder %v457_v53, inf }
  0xb2   :  { %v341_v60 = vpop.eup %340  ;;  %362 = vrcp.f32 %v198_v58  ;;  %v191_v61 = vsel %vm189_vm12, %v190_v56, %v188_v59  ;;  %v207_v62 = vmul.f32 %v339_v57, %v434_v22  ;;  %vm252_vm11 = vcmp.eq.f32.partialorder %v457_v53, 0.0 }
  0xb3   :  { %364 = vrcp.f32 %v191_v61  ;;  %v200_v0 = vmul.f32 %v341_v60, %v436_v23  ;;  %v473_v1 = vpop.xlane.xlu1 %155  ;;  %v475_v2 = vpop.xlane.xlu0 %153  ;;  %vm243_vm12 = vcmp.eq.f32.partialorder %v459_v54, inf  ;;  %v246_v40 = vand.u32 2147483648, %v459_v54 }
  0xb4   :  { %v209_v3 = vsel %vm208_vm13, %v434_v22, %v207_v62  ;;  %366 = vrsqrt.f32 %v473_v1  ;;  %vm245_vm13 = vcmp.eq.f32.partialorder %v459_v54, 0.0  ;;  %v267_v48 = vand.u32 2147483648, %v473_v1 }
  0xb5   :  { %v343_v5 = vpop.eup %342  ;;  %v212_v6 = vsel %vm210_vm14, %v211_v63, %v209_v3  ;;  %v202_v7 = vsel %vm201_vm15, %v436_v23, %v200_v0  ;;  %368 = vrsqrt.f32 %v475_v2  ;;  %vm264_vm14 = vcmp.eq.f32.partialorder %v473_v1, inf }
  0xb6   :  { %v345_v8 = vpop.eup %344  ;;  %370 = vrcp.f32 %v212_v6  ;;  %v205_v9 = vsel %vm203_vm0, %v204_v4, %v202_v7  ;;  %v221_v10 = vmul.f32 %v343_v5, %v440_v29  ;;  %vm266_vm15 = vcmp.eq.f32.partialorder %v473_v1, 0.0 }
  0xb7   :  { %v347_v11 = vpop.eup %346  ;;  %372 = vrcp.f32 %v205_v9  ;;  %v214_v13 = vmul.f32 %v345_v8, %v442_v30  ;;  %vm257_vm0 = vcmp.eq.f32.partialorder %v475_v2, inf  ;;  %v260_v52 = vand.u32 2147483648, %v475_v2 }
  0xb8   :  { %v349_v14 = vpop.eup %348  ;;  %304 = vst.msk [vmem:[%s589_s1 + $0x10] sm:$0xff] %vm301_vm7, %v347_v11  ;;  %v223_v15 = vsel %vm222_vm1, %v440_v29, %v221_v10  ;;  %vm259_vm1 = vcmp.eq.f32.partialorder %v475_v2, 0.0 }
  0xb9   :  { %v351_v17 = vpop.eup %350  ;;  %302 = vst.msk [vmem:[%s589_s1] sm:$0xff] %vm301_vm7, %v349_v14  ;;  %v226_v18 = vsel %vm224_vm2, %v225_v12, %v223_v15  ;;  %v216_v19 = vsel %vm215_vm3, %v442_v30, %v214_v13 }
  0xba   :  { %v353_v20 = vpop.eup %352  ;;  %374 = vrcp.f32 %v226_v18  ;;  %v219_v21 = vsel %vm217_vm4, %v218_v16, %v216_v19  ;;  %v235_v22 = vmul.f32 %v351_v17, %v446_v41 }
  0xbb   :  { %v355_v23 = vpop.eup %354  ;;  %376 = vrcp.f32 %v219_v21  ;;  %v228_v25 = vmul.f32 %v353_v20, %v448_v42 }
  0xbc   :  { %v357_v26 = vpop.eup %356  ;;  %305 = vst.msk [vmem:[%s589_s1 + $0x18] sm:$0xff] %vm301_vm7, %v355_v23  ;;  %v237_v27 = vsel %vm236_vm5, %v446_v41, %v235_v22 }
  0xbd   :  { %v359_v29 = vpop.eup %358  ;;  %303 = vst.msk [vmem:[%s589_s1 + $0x8] sm:$0xff] %vm301_vm7, %v357_v26  ;;  %v240_v30 = vsel %vm238_vm6, %v239_v24, %v237_v27  ;;  %v230_v31 = vsel %vm229_vm8, %v448_v42, %v228_v25 }
  0xbe   :  { %v361_v32 = vpop.eup %360  ;;  %378 = vrcp.f32 %v240_v30  ;;  %v233_v33 = vsel %vm231_vm9, %v232_v28, %v230_v31  ;;  %v249_v34 = vmul.f32 %v359_v29, %v457_v53 }
  0xbf   :  { %v363_v35 = vpop.eup %362  ;;  %380 = vrcp.f32 %v233_v33  ;;  %v242_v37 = vmul.f32 %v361_v32, %v459_v54 }
  0xc0   :  { %v365_v38 = vpop.eup %364  ;;  %307 = vst.msk [vmem:[%s589_s1 + $0x28] sm:$0xff] %vm301_vm7, %v363_v35  ;;  %v251_v39 = vsel %vm250_vm10, %v457_v53, %v249_v34 }
  0xc1   :  { %v367_v41 = vpop.eup %366  ;;  %306 = vst.msk [vmem:[%s589_s1 + $0x20] sm:$0xff] %vm301_vm7, %v365_v38  ;;  %v254_v42 = vsel %vm252_vm11, %v253_v36, %v251_v39  ;;  %v244_v43 = vsel %vm243_vm12, %v459_v54, %v242_v37 }
  0xc2   :  { %v369_v44 = vpop.eup %368  ;;  %382 = vrcp.f32 %v254_v42  ;;  %v247_v45 = vsel %vm245_vm13, %v246_v40, %v244_v43  ;;  %v263_v46 = vmul.f32 %v367_v41, %v473_v1 }
  0xc3   :  { %v371_v47 = vpop.eup %370  ;;  %384 = vrcp.f32 %v247_v45  ;;  %v256_v49 = vmul.f32 %v369_v44, %v475_v2 }
  0xc4   :  { %v373_v50 = vpop.eup %372  ;;  %309 = vst.msk [vmem:[%s589_s1 + $0x38] sm:$0xff] %vm301_vm7, %v371_v47  ;;  %v265_v51 = vsel %vm264_vm14, %v473_v1, %v263_v46 }
  0xc5   :  { %308 = vst.msk [vmem:[%s589_s1 + $0x30] sm:$0xff] %vm301_vm7, %v373_v50  ;;  %v268_v53 = vsel %vm266_vm15, %v267_v48, %v265_v51  ;;  %v258_v54 = vsel %vm257_vm0, %v475_v2, %v256_v49 }
  0xc6   :  { %386 = vrcp.f32 %v268_v53  ;;  %v261_v55 = vsel %vm259_vm1, %v260_v52, %v258_v54 }
  0xc7   :  { %v375_v56 = vpop.eup %374  ;;  %388 = vrcp.f32 %v261_v55 }
  0xc8   :  { %v377_v57 = vpop.eup %376  ;;  %311 = vst.msk [vmem:[%s589_s1 + $0x48] sm:$0xff] %vm301_vm7, %v375_v56 }
  0xc9   :  { %310 = vst.msk [vmem:[%s589_s1 + $0x40] sm:$0xff] %vm301_vm7, %v377_v57 }
  0xcb   :  { %v379_v58 = vpop.eup %378 }
  0xcc   :  { %v381_v59 = vpop.eup %380  ;;  %313 = vst.msk [vmem:[%s589_s1 + $0x58] sm:$0xff] %vm301_vm7, %v379_v58 }
  0xcd   :  { %312 = vst.msk [vmem:[%s589_s1 + $0x50] sm:$0xff] %vm301_vm7, %v381_v59 }
  0xcf   :  { %v383_v60 = vpop.eup %382 }
  0xd0   :  { %v385_v61 = vpop.eup %384  ;;  %315 = vst.msk [vmem:[%s589_s1 + $0x68] sm:$0xff] %vm301_vm7, %v383_v60 }
  0xd1   :  { %314 = vst.msk [vmem:[%s589_s1 + $0x60] sm:$0xff] %vm301_vm7, %v385_v61 }
  0xd3   :  { %v387_v62 = vpop.eup %386 }
  0xd4   :  { %v389_v63 = vpop.eup %388  ;;  %317 = vst.msk [vmem:[%s589_s1 + $0x78] sm:$0xff] %vm301_vm7, %v387_v62 }
  0xd5   :  { %316 = vst.msk [vmem:[%s589_s1 + $0x70] sm:$0xff] %vm301_vm7, %v389_v63 }
  0xd6   :  { %322 = vsyncpa [#allocation4], 1 }

</bundles_post_ra>
